<compile_context>
chip_gen: v5e
topology: v5e:2x2
jax: 0.10.0
libtpu: 0.0.40
codegen_flags: <defaults>
</compile_context>

<pallas_src>
import math
import functools

import jax
import jax.numpy as jnp
from jax import lax
from jax.experimental import pallas as pl
from jax.experimental.pallas import tpu as pltpu


def _attn_kernel(x_ref, wq_ref, wk_ref, wv_ref, bq_ref, bk_ref, bv_ref,
                 wp_ref, bp_ref, o_ref,
                 kh_ref, vh_ref, qh_ref, m_sc, l_sc, acc_sc, y_sc,
                 *, n_head, is_causal, tq, tk, compute_dtype):
    """One (batch, query-tile) grid step: qkv -> flash MHA -> out proj."""
    T = x_ref.shape[1]
    C = x_ref.shape[2]
    H = n_head
    hd = C // H
    n_kv = T // tk
    scale = 1.0 / math.sqrt(hd)
    cdt = compute_dtype
    neg_big = jnp.float32(-1e30)

    qi = pl.program_id(1)

    # ---- K/V projection + head split: ONCE per batch.  The query-tile axis is
    # the inner "arbitrary" grid axis, so this scratch persists across tiles.
    @pl.when(qi == 0)
    def _():
        xkv = x_ref[0]                                              # (T, C)
        k = jnp.dot(xkv, wk_ref[...],
                    preferred_element_type=jnp.float32) + bk_ref[...]
        v = jnp.dot(xkv, wv_ref[...],
                    preferred_element_type=jnp.float32) + bv_ref[...]
        k = k.astype(cdt)
        v = v.astype(cdt)
        # Head split = one pass of per-head slice stores into VMEM scratch
        # (no stack/concatenate, no H-fold stacked value copies).
        for h in range(H):
            kh_ref[h] = k[:, h * hd:(h + 1) * hd]
            vh_ref[h] = v[:, h * hd:(h + 1) * hd]

    # ---- Q projection for this query tile (sliced from the resident block) --
    q_start = pl.multiple_of(qi * tq, tq)
    xq = x_ref[0, pl.ds(q_start, tq), :]                            # (tq, C)
    q = jnp.dot(xq, wq_ref[...],
                preferred_element_type=jnp.float32) + bq_ref[...]
    q = q * scale                                   # fold 1/sqrt(hd) into q
    for h in range(H):
        qh_ref[h] = q[:, h * hd:(h + 1) * hd].astype(cdt)
    qh = qh_ref[...]                                                # (H, tq, hd)

    # ---- flash-style online softmax over key blocks ----
    m_sc[...] = jnp.full(m_sc.shape, -1e30, jnp.float32)
    l_sc[...] = jnp.zeros(l_sc.shape, jnp.float32)
    acc_sc[...] = jnp.zeros(acc_sc.shape, jnp.float32)

    if is_causal:
        # mask iotas built once per grid step (not per head / per block)
        q_pos = qi * tq + lax.broadcasted_iota(jnp.int32, (tq, tk), 0)
        k_off = lax.broadcasted_iota(jnp.int32, (tq, tk), 1)

    def kv_step(kv):
        k_start = pl.multiple_of(kv * tk, tk)
        k_blk = kh_ref[:, pl.ds(k_start, tk), :]                    # (H, tk, hd)
        v_blk = vh_ref[:, pl.ds(k_start, tk), :]
        # batched (leading head dim) score matmul
        s = jnp.einsum('hqd,hkd->hqk', qh, k_blk,
                       preferred_element_type=jnp.float32)          # (H, tq, tk)
        if is_causal:
            keep = (k_off + kv * tk) <= q_pos                       # (tq, tk)
            s = jnp.where(keep[None, :, :], s, neg_big)
        m_prev = m_sc[...]
        m_new = jnp.maximum(m_prev, jnp.max(s, axis=-1, keepdims=True))
        alpha = jnp.exp(m_prev - m_new)
        # TODO(synk): on v6e/v7x a bf16 exp would double EUP throughput; kept
        # f32 so the -1e30 mask and s - m_new subtraction never overflow bf16.
        p = jnp.exp(s - m_new)                                      # unnormalized
        l_sc[...] = alpha * l_sc[...] + jnp.sum(p, axis=-1, keepdims=True)
        acc_sc[...] = alpha * acc_sc[...] + jnp.einsum(
            'hqk,hkd->hqd', p.astype(cdt), v_blk,
            preferred_element_type=jnp.float32)
        m_sc[...] = m_new

    def body(kv, carry):
        if is_causal:
            # Skip key blocks that lie entirely above the causal diagonal.
            # (The first block, kv == 0, is never skipped, so l > 0 holds.)
            @pl.when(kv * tk < (qi + 1) * tq)
            def _():
                kv_step(kv)
        else:
            kv_step(kv)
        return carry

    lax.fori_loop(0, n_kv, body, 0, unroll=min(2, n_kv))

    # deferred normalization (EUP reciprocal when running the bf16 fast path)
    approx = jnp.dtype(cdt) != jnp.dtype(jnp.float32)
    o = acc_sc[...] * pl.reciprocal(l_sc[...], approx=approx)       # (H, tq, hd)

    # merge heads with one pass of slice stores (no concatenate), then the
    # output projection as a single full-C contraction on the MXU
    for h in range(H):
        y_sc[:, h * hd:(h + 1) * hd] = o[h].astype(cdt)
    out = jnp.dot(y_sc[...], wp_ref[...],
                  preferred_element_type=jnp.float32) + bp_ref[...]

    # TODO(synk): nn.Dropout(0.2) is the identity in eval mode; no dropout RNG.
    o_ref[0] = out.astype(o_ref.dtype)


def _pick_tile(n, candidates):
    for c in candidates:
        if c <= n and n % c == 0:
            return c
    return n


def _vmem_bytes_estimate(T, C, n_head, tq, tk, cdt, out_dtype):
    """Residency estimate with (sublane, 128-lane) padding + double buffering."""
    def pad(n, m):
        return ((n + m - 1) // m) * m
    cb = jnp.dtype(cdt).itemsize
    ob = jnp.dtype(out_dtype).itemsize
    sub_c = max(8, 32 // cb)
    sub_o = max(8, 32 // ob)
    hd = C // n_head
    lane = 128
    est = 0
    est += 2 * pad(T, sub_c) * pad(C, lane) * cb             # x block (dbl-buf)
    est += 2 * 4 * pad(C, sub_c) * pad(C, lane) * cb         # 4 weights (dbl-buf)
    est += 2 * 4 * 8 * pad(C, lane) * 4                      # biases (f32, dbl-buf)
    est += 2 * pad(tq, sub_o) * pad(C, lane) * ob            # out tile (dbl-buf)
    est += 2 * n_head * pad(T, sub_c) * pad(hd, lane) * cb   # kh + vh scratch
    est += n_head * pad(tq, sub_c) * pad(hd, lane) * cb      # qh scratch
    est += 2 * n_head * pad(tq, 8) * lane * 4                # m, l scratch
    est += n_head * pad(tq, 8) * pad(hd, lane) * 4           # acc scratch
    est += pad(tq, sub_c) * pad(C, lane) * cb                # y scratch
    est += 3 * n_head * pad(tq, 8) * pad(tk, lane) * 4       # s / p working set
    est += 2 << 20                                           # headroom
    return est


def self_attention(x, w_attn, b_attn, w_proj, b_proj, *, n_head,
                   is_causal=False, compute_dtype=jnp.bfloat16):
    """x: (B, T, C); w_attn: (C, 3C); b_attn: (3C,); w_proj: (C, C); b_proj: (C,)."""
    B, T, C = x.shape
    assert C % n_head == 0
    out_dtype = x.dtype
    hd = C // n_head
    cdt = compute_dtype

    # sequence tiling: query tiles become a grid axis, key tiles an in-kernel loop
    tq = _pick_tile(T, (256, 128, 64, 32, 16, 8))
    tk = _pick_tile(T, (512, 256, 128))
    nq = T // tq

    # split fused qkv params once in the wrapper (free); cast MXU operands
    x_c = x.astype(cdt)
    w_q = w_attn[:, 0 * C:1 * C].astype(cdt)
    w_k = w_attn[:, 1 * C:2 * C].astype(cdt)
    w_v = w_attn[:, 2 * C:3 * C].astype(cdt)
    w_p = w_proj.astype(cdt)
    # biases (and all softmax statistics / accumulators) stay f32
    b_q = b_attn[0 * C:1 * C].reshape(1, C).astype(jnp.float32)
    b_k = b_attn[1 * C:2 * C].reshape(1, C).astype(jnp.float32)
    b_v = b_attn[2 * C:3 * C].reshape(1, C).astype(jnp.float32)
    b_p = b_proj.reshape(1, C).astype(jnp.float32)

    kernel = functools.partial(_attn_kernel, n_head=n_head,
                               is_causal=is_causal, tq=tq, tk=tk,
                               compute_dtype=cdt)
    const = lambda b, qi: (0, 0)

    # VMEM budget: v5e scoped default is only 16 MiB and v7x physical is
    # 64 MiB -- derive the limit from the actual residency, cap at 64 MiB.
    # (Weight/bias blocks never change across the grid; their second pipeline
    # buffer is included in the estimate.)
    vmem_limit = int(min(64 * 2**20,
                         max(32 * 2**20,
                             _vmem_bytes_estimate(T, C, n_head, tq, tk, cdt,
                                                  out_dtype))))

    return pl.pallas_call(
        kernel,
        out_shape=jax.ShapeDtypeStruct((B, T, C), out_dtype),
        grid=(B, nq),
        in_specs=[
            pl.BlockSpec((1, T, C), lambda b, qi: (b, 0, 0)),  # x (full sequence)
            pl.BlockSpec((C, C), const),                       # w_q
            pl.BlockSpec((C, C), const),                       # w_k
            pl.BlockSpec((C, C), const),                       # w_v
            pl.BlockSpec((1, C), const),                       # b_q
            pl.BlockSpec((1, C), const),                       # b_k
            pl.BlockSpec((1, C), const),                       # b_v
            pl.BlockSpec((C, C), const),                       # w_proj
            pl.BlockSpec((1, C), const),                       # b_proj
        ],
        out_specs=pl.BlockSpec((1, tq, C), lambda b, qi: (b, qi, 0)),
        scratch_shapes=[
            pltpu.VMEM((n_head, T, hd), cdt),           # kh (per-batch K cache)
            pltpu.VMEM((n_head, T, hd), cdt),           # vh (per-batch V cache)
            pltpu.VMEM((n_head, tq, hd), cdt),          # qh (head-split q tile)
            pltpu.VMEM((n_head, tq, 1), jnp.float32),   # m (running max)
            pltpu.VMEM((n_head, tq, 1), jnp.float32),   # l (running denom)
            pltpu.VMEM((n_head, tq, hd), jnp.float32),  # acc (unnormalized out)
            pltpu.VMEM((tq, C), cdt),                   # y (merged heads)
        ],
        # The query-tile axis carries the cached K/V scratch -> "arbitrary";
        # B stays "parallel" so v7x megacore still splits work across its two
        # TensorCores.  (For B == 1 a two-pass structure would be preferable.)
        compiler_params=pltpu.CompilerParams(
            dimension_semantics=("parallel", "arbitrary"),
            vmem_limit_bytes=vmem_limit),
    )(x_c, w_q, w_k, w_v, b_q, b_k, b_v, w_p, b_p)


def self_attention_ref(x, w_attn, b_attn, w_proj, b_proj, *, n_head,
                       is_causal=False):
    """Pure-JAX reference matching the PyTorch forward semantics (eval mode)."""
    B, T, C = x.shape
    hd = C // n_head
    qkv = x @ w_attn + b_attn
    q, k, v = jnp.split(qkv, 3, axis=-1)

    def to_heads(t):
        return t.reshape(B, T, n_head, hd).transpose(0, 2, 1, 3)

    q, k, v = to_heads(q), to_heads(k), to_heads(v)
    s = jnp.einsum('bhtd,bhsd->bhts', q, k) / math.sqrt(hd)
    if is_causal:
        mask = jnp.tril(jnp.ones((T, T), dtype=bool))
        s = jnp.where(mask, s, -1e30)
    p = jax.nn.softmax(s, axis=-1)
    y = jnp.einsum('bhts,bhsd->bhtd', p, v)
    y = y.transpose(0, 2, 1, 3).reshape(B, T, C)
    return y @ w_proj + b_proj


if __name__ == "__main__":
    # small shapes consistent with the module: B=2, T=8, C=n_embd=32, n_head=4
    B, T, C, n_head = 2, 8, 32, 4

    key = jax.random.PRNGKey(0)
    kx, ka, kab, kp, kpb = jax.random.split(key, 5)

    bound = 1.0 / math.sqrt(C)
    w_attn = jax.random.uniform(ka, (C, 3 * C), jnp.float32, -bound, bound)
    b_attn = jax.random.uniform(kab, (3 * C,), jnp.float32, -bound, bound)
    w_proj = jax.random.uniform(kp, (C, C), jnp.float32, -bound, bound)
    b_proj = jax.random.uniform(kpb, (C,), jnp.float32, -bound, bound)
    x = jax.random.normal(kx, (B, T, C), jnp.float32)

    for is_causal in (False, True):
        ref = self_attention_ref(x, w_attn, b_attn, w_proj, b_proj,
                                 n_head=n_head, is_causal=is_causal)

        # f32 compute path: strict check
        out32 = jax.block_until_ready(self_attention(
            x, w_attn, b_attn, w_proj, b_proj, n_head=n_head,
            is_causal=is_causal, compute_dtype=jnp.float32))
        assert out32.shape == (B, T, C)
        assert jnp.allclose(out32, ref, atol=2e-4, rtol=2e-4), (
            f"f32 causal={is_causal} max err {jnp.max(jnp.abs(out32 - ref))}")

        # bf16 MXU operands with f32 accumulation: loose check
        outbf = jax.block_until_ready(self_attention(
            x, w_attn, b_attn, w_proj, b_proj, n_head=n_head,
            is_causal=is_causal, compute_dtype=jnp.bfloat16))
        assert outbf.shape == (B, T, C)
        assert jnp.allclose(outbf, ref, atol=5e-2, rtol=5e-2), (
            f"bf16 causal={is_causal} max err {jnp.max(jnp.abs(outbf - ref))}")

    print("KERNEL_OK")
</pallas_src>

<mosaic_0001>
module attributes {stable_mosaic.version = 11 : i64} {
  func.func @_attn_kernel(%arg0: i32, %arg1: i32, %arg2: memref<1x8x32xf32, #tpu.memory_space<vmem>>, %arg3: memref<32x32xf32, #tpu.memory_space<vmem>>, %arg4: memref<32x32xf32, #tpu.memory_space<vmem>>, %arg5: memref<32x32xf32, #tpu.memory_space<vmem>>, %arg6: memref<1x32xf32, #tpu.memory_space<vmem>>, %arg7: memref<1x32xf32, #tpu.memory_space<vmem>>, %arg8: memref<1x32xf32, #tpu.memory_space<vmem>>, %arg9: memref<32x32xf32, #tpu.memory_space<vmem>>, %arg10: memref<1x32xf32, #tpu.memory_space<vmem>>, %arg11: memref<1x8x32xf32, #tpu.memory_space<vmem>>, %arg12: memref<4x8x8xf32, #tpu.memory_space<vmem>>, %arg13: memref<4x8x8xf32, #tpu.memory_space<vmem>>, %arg14: memref<4x8x8xf32, #tpu.memory_space<vmem>>, %arg15: memref<4x8x1xf32, #tpu.memory_space<vmem>>, %arg16: memref<4x8x1xf32, #tpu.memory_space<vmem>>, %arg17: memref<4x8x8xf32, #tpu.memory_space<vmem>>, %arg18: memref<8x32xf32, #tpu.memory_space<vmem>>) attributes {dimension_semantics = [#tpu.dimension_semantics<parallel>, #tpu.dimension_semantics<arbitrary>], iteration_bounds = array<i64: 2, 1>, scalar_prefetch = 0 : i64, scratch_operands = 7 : i64, tpu.core_type = #tpu.core_type<tc>, window_params = [{transform_indices = @transform_0, window_bounds = array<i64: 1, 8, 32>}, {pipeline_mode = #tpu.pipeline_mode<synchronous>, transform_indices = @transform_1, window_bounds = array<i64: 32, 32>}, {pipeline_mode = #tpu.pipeline_mode<synchronous>, transform_indices = @transform_2, window_bounds = array<i64: 32, 32>}, {pipeline_mode = #tpu.pipeline_mode<synchronous>, transform_indices = @transform_3, window_bounds = array<i64: 32, 32>}, {pipeline_mode = #tpu.pipeline_mode<synchronous>, transform_indices = @transform_4, window_bounds = array<i64: 1, 32>}, {pipeline_mode = #tpu.pipeline_mode<synchronous>, transform_indices = @transform_5, window_bounds = array<i64: 1, 32>}, {pipeline_mode = #tpu.pipeline_mode<synchronous>, transform_indices = @transform_6, window_bounds = array<i64: 1, 32>}, {pipeline_mode = #tpu.pipeline_mode<synchronous>, transform_indices = @transform_7, window_bounds = array<i64: 32, 32>}, {pipeline_mode = #tpu.pipeline_mode<synchronous>, transform_indices = @transform_8, window_bounds = array<i64: 1, 32>}, {transform_indices = @transform_9, window_bounds = array<i64: 1, 8, 32>}]} {
    %c0_i32 = arith.constant 0 : i32
    %0 = arith.cmpi eq, %arg1, %c0_i32 : i32
    %1 = arith.extui %0 : i1 to i32
    %c0_i32_0 = arith.constant 0 : i32
    %2 = arith.cmpi ne, %1, %c0_i32_0 : i32
    scf.if %2 {
      %c0_80 = arith.constant 0 : index
      %c0_81 = arith.constant 0 : index
      %c0_82 = arith.constant 0 : index
      %93 = vector.load %arg2[%c0_80, %c0_81, %c0_82] : memref<1x8x32xf32, #tpu.memory_space<vmem>>, vector<1x8x32xf32>
      %94 = vector.shape_cast %93 : vector<1x8x32xf32> to vector<8x32xf32>
      %c0_83 = arith.constant 0 : index
      %c0_84 = arith.constant 0 : index
      %95 = vector.load %arg4[%c0_83, %c0_84] : memref<32x32xf32, #tpu.memory_space<vmem>>, vector<32x32xf32>
      %cst_85 = arith.constant dense<0.000000e+00> : vector<8x32xf32>
      %96 = tpu.matmul %94, %95, %cst_85 {dimension_numbers = #tpu.dot_dimension_numbers<[1], [0], [0], [1], [0, 0, 1, 1], [], []>} : vector<8x32xf32>, vector<32x32xf32>, vector<8x32xf32> -> vector<8x32xf32>
      %c0_86 = arith.constant 0 : index
      %c0_87 = arith.constant 0 : index
      %97 = vector.load %arg7[%c0_86, %c0_87] : memref<1x32xf32, #tpu.memory_space<vmem>>, vector<1x32xf32>
      %98 = vector.broadcast %97 : vector<1x32xf32> to vector<8x32xf32>
      %99 = arith.addf %96, %98 : vector<8x32xf32>
      %c0_88 = arith.constant 0 : index
      %c0_89 = arith.constant 0 : index
      %100 = vector.load %arg5[%c0_88, %c0_89] : memref<32x32xf32, #tpu.memory_space<vmem>>, vector<32x32xf32>
      %cst_90 = arith.constant dense<0.000000e+00> : vector<8x32xf32>
      %101 = tpu.matmul %94, %100, %cst_90 {dimension_numbers = #tpu.dot_dimension_numbers<[1], [0], [0], [1], [0, 0, 1, 1], [], []>} : vector<8x32xf32>, vector<32x32xf32>, vector<8x32xf32> -> vector<8x32xf32>
      %c0_91 = arith.constant 0 : index
      %c0_92 = arith.constant 0 : index
      %102 = vector.load %arg8[%c0_91, %c0_92] : memref<1x32xf32, #tpu.memory_space<vmem>>, vector<1x32xf32>
      %103 = vector.broadcast %102 : vector<1x32xf32> to vector<8x32xf32>
      %104 = arith.addf %101, %103 : vector<8x32xf32>
      %105 = vector.extract_strided_slice %99 {offsets = [0, 0], sizes = [8, 8], strides = [1, 1]} : vector<8x32xf32> to vector<8x8xf32>
      %c0_93 = arith.constant 0 : index
      %c0_94 = arith.constant 0 : index
      %c0_95 = arith.constant 0 : index
      %106 = vector.load %arg12[%c0_93, %c0_94, %c0_95] : memref<4x8x8xf32, #tpu.memory_space<vmem>>, vector<1x8x8xf32>
      %107 = vector.shape_cast %106 : vector<1x8x8xf32> to vector<8x8xf32>
      %108 = vector.shape_cast %105 : vector<8x8xf32> to vector<1x8x8xf32>
      tpu.vector_store %arg12[%c0_93, %c0_94, %c0_95], %108 {strides = array<i32>} : memref<4x8x8xf32, #tpu.memory_space<vmem>>, vector<1x8x8xf32>,
      %109 = vector.extract_strided_slice %104 {offsets = [0, 0], sizes = [8, 8], strides = [1, 1]} : vector<8x32xf32> to vector<8x8xf32>
      %c0_96 = arith.constant 0 : index
      %c0_97 = arith.constant 0 : index
      %c0_98 = arith.constant 0 : index
      %110 = vector.load %arg13[%c0_96, %c0_97, %c0_98] : memref<4x8x8xf32, #tpu.memory_space<vmem>>, vector<1x8x8xf32>
      %111 = vector.shape_cast %110 : vector<1x8x8xf32> to vector<8x8xf32>
      %112 = vector.shape_cast %109 : vector<8x8xf32> to vector<1x8x8xf32>
      tpu.vector_store %arg13[%c0_96, %c0_97, %c0_98], %112 {strides = array<i32>} : memref<4x8x8xf32, #tpu.memory_space<vmem>>, vector<1x8x8xf32>,
      %113 = vector.extract_strided_slice %99 {offsets = [0, 8], sizes = [8, 8], strides = [1, 1]} : vector<8x32xf32> to vector<8x8xf32>
      %c1_99 = arith.constant 1 : index
      %c0_100 = arith.constant 0 : index
      %c0_101 = arith.constant 0 : index
      %114 = vector.load %arg12[%c1_99, %c0_100, %c0_101] : memref<4x8x8xf32, #tpu.memory_space<vmem>>, vector<1x8x8xf32>
      %115 = vector.shape_cast %114 : vector<1x8x8xf32> to vector<8x8xf32>
      %116 = vector.shape_cast %113 : vector<8x8xf32> to vector<1x8x8xf32>
      tpu.vector_store %arg12[%c1_99, %c0_100, %c0_101], %116 {strides = array<i32>} : memref<4x8x8xf32, #tpu.memory_space<vmem>>, vector<1x8x8xf32>,
      %117 = vector.extract_strided_slice %104 {offsets = [0, 8], sizes = [8, 8], strides = [1, 1]} : vector<8x32xf32> to vector<8x8xf32>
      %c1_102 = arith.constant 1 : index
      %c0_103 = arith.constant 0 : index
      %c0_104 = arith.constant 0 : index
      %118 = vector.load %arg13[%c1_102, %c0_103, %c0_104] : memref<4x8x8xf32, #tpu.memory_space<vmem>>, vector<1x8x8xf32>
      %119 = vector.shape_cast %118 : vector<1x8x8xf32> to vector<8x8xf32>
      %120 = vector.shape_cast %117 : vector<8x8xf32> to vector<1x8x8xf32>
      tpu.vector_store %arg13[%c1_102, %c0_103, %c0_104], %120 {strides = array<i32>} : memref<4x8x8xf32, #tpu.memory_space<vmem>>, vector<1x8x8xf32>,
      %121 = vector.extract_strided_slice %99 {offsets = [0, 16], sizes = [8, 8], strides = [1, 1]} : vector<8x32xf32> to vector<8x8xf32>
      %c2_105 = arith.constant 2 : index
      %c0_106 = arith.constant 0 : index
      %c0_107 = arith.constant 0 : index
      %122 = vector.load %arg12[%c2_105, %c0_106, %c0_107] : memref<4x8x8xf32, #tpu.memory_space<vmem>>, vector<1x8x8xf32>
      %123 = vector.shape_cast %122 : vector<1x8x8xf32> to vector<8x8xf32>
      %124 = vector.shape_cast %121 : vector<8x8xf32> to vector<1x8x8xf32>
      tpu.vector_store %arg12[%c2_105, %c0_106, %c0_107], %124 {strides = array<i32>} : memref<4x8x8xf32, #tpu.memory_space<vmem>>, vector<1x8x8xf32>,
      %125 = vector.extract_strided_slice %104 {offsets = [0, 16], sizes = [8, 8], strides = [1, 1]} : vector<8x32xf32> to vector<8x8xf32>
      %c2_108 = arith.constant 2 : index
      %c0_109 = arith.constant 0 : index
      %c0_110 = arith.constant 0 : index
      %126 = vector.load %arg13[%c2_108, %c0_109, %c0_110] : memref<4x8x8xf32, #tpu.memory_space<vmem>>, vector<1x8x8xf32>
      %127 = vector.shape_cast %126 : vector<1x8x8xf32> to vector<8x8xf32>
      %128 = vector.shape_cast %125 : vector<8x8xf32> to vector<1x8x8xf32>
      tpu.vector_store %arg13[%c2_108, %c0_109, %c0_110], %128 {strides = array<i32>} : memref<4x8x8xf32, #tpu.memory_space<vmem>>, vector<1x8x8xf32>,
      %129 = vector.extract_strided_slice %99 {offsets = [0, 24], sizes = [8, 8], strides = [1, 1]} : vector<8x32xf32> to vector<8x8xf32>
      %c3_111 = arith.constant 3 : index
      %c0_112 = arith.constant 0 : index
      %c0_113 = arith.constant 0 : index
      %130 = vector.load %arg12[%c3_111, %c0_112, %c0_113] : memref<4x8x8xf32, #tpu.memory_space<vmem>>, vector<1x8x8xf32>
      %131 = vector.shape_cast %130 : vector<1x8x8xf32> to vector<8x8xf32>
      %132 = vector.shape_cast %129 : vector<8x8xf32> to vector<1x8x8xf32>
      tpu.vector_store %arg12[%c3_111, %c0_112, %c0_113], %132 {strides = array<i32>} : memref<4x8x8xf32, #tpu.memory_space<vmem>>, vector<1x8x8xf32>,
      %133 = vector.extract_strided_slice %104 {offsets = [0, 24], sizes = [8, 8], strides = [1, 1]} : vector<8x32xf32> to vector<8x8xf32>
      %c3_114 = arith.constant 3 : index
      %c0_115 = arith.constant 0 : index
      %c0_116 = arith.constant 0 : index
      %134 = vector.load %arg13[%c3_114, %c0_115, %c0_116] : memref<4x8x8xf32, #tpu.memory_space<vmem>>, vector<1x8x8xf32>
      %135 = vector.shape_cast %134 : vector<1x8x8xf32> to vector<8x8xf32>
      %136 = vector.shape_cast %133 : vector<8x8xf32> to vector<1x8x8xf32>
      tpu.vector_store %arg13[%c3_114, %c0_115, %c0_116], %136 {strides = array<i32>} : memref<4x8x8xf32, #tpu.memory_space<vmem>>, vector<1x8x8xf32>,
    } else {
    }
    %c8_i32 = arith.constant 8 : i32
    %3 = arith.muli %arg1, %c8_i32 : i32
    %4 = tpu.assume_multiple %3, 8 : i32
    %c0 = arith.constant 0 : index
    %5 = arith.index_cast %4 : i32 to index
    %c0_1 = arith.constant 0 : index
    %6 = vector.load %arg2[%c0, %5, %c0_1] : memref<1x8x32xf32, #tpu.memory_space<vmem>>, vector<1x8x32xf32>
    %7 = vector.shape_cast %6 : vector<1x8x32xf32> to vector<8x32xf32>
    %c0_2 = arith.constant 0 : index
    %c0_3 = arith.constant 0 : index
    %8 = vector.load %arg3[%c0_2, %c0_3] : memref<32x32xf32, #tpu.memory_space<vmem>>, vector<32x32xf32>
    %cst = arith.constant dense<0.000000e+00> : vector<8x32xf32>
    %9 = tpu.matmul %7, %8, %cst {dimension_numbers = #tpu.dot_dimension_numbers<[1], [0], [0], [1], [0, 0, 1, 1], [], []>} : vector<8x32xf32>, vector<32x32xf32>, vector<8x32xf32> -> vector<8x32xf32>
    %c0_4 = arith.constant 0 : index
    %c0_5 = arith.constant 0 : index
    %10 = vector.load %arg6[%c0_4, %c0_5] : memref<1x32xf32, #tpu.memory_space<vmem>>, vector<1x32xf32>
    %11 = vector.broadcast %10 : vector<1x32xf32> to vector<8x32xf32>
    %12 = arith.addf %9, %11 : vector<8x32xf32>
    %cst_6 = arith.constant 0.353553385 : f32
    %13 = vector.broadcast %cst_6 : f32 to vector<8x32xf32>
    %14 = arith.mulf %12, %13 : vector<8x32xf32>
    %15 = vector.extract_strided_slice %14 {offsets = [0, 0], sizes = [8, 8], strides = [1, 1]} : vector<8x32xf32> to vector<8x8xf32>
    %c0_7 = arith.constant 0 : index
    %c0_8 = arith.constant 0 : index
    %c0_9 = arith.constant 0 : index
    %16 = vector.load %arg14[%c0_7, %c0_8, %c0_9] : memref<4x8x8xf32, #tpu.memory_space<vmem>>, vector<1x8x8xf32>
    %17 = vector.shape_cast %16 : vector<1x8x8xf32> to vector<8x8xf32>
    %18 = vector.shape_cast %15 : vector<8x8xf32> to vector<1x8x8xf32>
    tpu.vector_store %arg14[%c0_7, %c0_8, %c0_9], %18 {strides = array<i32>} : memref<4x8x8xf32, #tpu.memory_space<vmem>>, vector<1x8x8xf32>,
    %19 = vector.extract_strided_slice %14 {offsets = [0, 8], sizes = [8, 8], strides = [1, 1]} : vector<8x32xf32> to vector<8x8xf32>
    %c1 = arith.constant 1 : index
    %c0_10 = arith.constant 0 : index
    %c0_11 = arith.constant 0 : index
    %20 = vector.load %arg14[%c1, %c0_10, %c0_11] : memref<4x8x8xf32, #tpu.memory_space<vmem>>, vector<1x8x8xf32>
    %21 = vector.shape_cast %20 : vector<1x8x8xf32> to vector<8x8xf32>
    %22 = vector.shape_cast %19 : vector<8x8xf32> to vector<1x8x8xf32>
    tpu.vector_store %arg14[%c1, %c0_10, %c0_11], %22 {strides = array<i32>} : memref<4x8x8xf32, #tpu.memory_space<vmem>>, vector<1x8x8xf32>,
    %23 = vector.extract_strided_slice %14 {offsets = [0, 16], sizes = [8, 8], strides = [1, 1]} : vector<8x32xf32> to vector<8x8xf32>
    %c2 = arith.constant 2 : index
    %c0_12 = arith.constant 0 : index
    %c0_13 = arith.constant 0 : index
    %24 = vector.load %arg14[%c2, %c0_12, %c0_13] : memref<4x8x8xf32, #tpu.memory_space<vmem>>, vector<1x8x8xf32>
    %25 = vector.shape_cast %24 : vector<1x8x8xf32> to vector<8x8xf32>
    %26 = vector.shape_cast %23 : vector<8x8xf32> to vector<1x8x8xf32>
    tpu.vector_store %arg14[%c2, %c0_12, %c0_13], %26 {strides = array<i32>} : memref<4x8x8xf32, #tpu.memory_space<vmem>>, vector<1x8x8xf32>,
    %27 = vector.extract_strided_slice %14 {offsets = [0, 24], sizes = [8, 8], strides = [1, 1]} : vector<8x32xf32> to vector<8x8xf32>
    %c3 = arith.constant 3 : index
    %c0_14 = arith.constant 0 : index
    %c0_15 = arith.constant 0 : index
    %28 = vector.load %arg14[%c3, %c0_14, %c0_15] : memref<4x8x8xf32, #tpu.memory_space<vmem>>, vector<1x8x8xf32>
    %29 = vector.shape_cast %28 : vector<1x8x8xf32> to vector<8x8xf32>
    %30 = vector.shape_cast %27 : vector<8x8xf32> to vector<1x8x8xf32>
    tpu.vector_store %arg14[%c3, %c0_14, %c0_15], %30 {strides = array<i32>} : memref<4x8x8xf32, #tpu.memory_space<vmem>>, vector<1x8x8xf32>,
    %c0_16 = arith.constant 0 : index
    %c0_17 = arith.constant 0 : index
    %c0_18 = arith.constant 0 : index
    %31 = vector.load %arg14[%c0_16, %c0_17, %c0_18] : memref<4x8x8xf32, #tpu.memory_space<vmem>>, vector<4x8x8xf32>
    %cst_19 = arith.constant -1.000000e+30 : f32
    %32 = vector.broadcast %cst_19 : f32 to vector<4x8x1xf32>
    %c0_20 = arith.constant 0 : index
    %c0_21 = arith.constant 0 : index
    %c0_22 = arith.constant 0 : index
    %33 = vector.load %arg15[%c0_20, %c0_21, %c0_22] : memref<4x8x1xf32, #tpu.memory_space<vmem>>, vector<4x8x1xf32>
    tpu.vector_store %arg15[%c0_20, %c0_21, %c0_22], %32 {strides = array<i32>} : memref<4x8x1xf32, #tpu.memory_space<vmem>>, vector<4x8x1xf32>,
    %cst_23 = arith.constant 0.000000e+00 : f32
    %34 = vector.broadcast %cst_23 : f32 to vector<4x8x1xf32>
    %c0_24 = arith.constant 0 : index
    %c0_25 = arith.constant 0 : index
    %c0_26 = arith.constant 0 : index
    %35 = vector.load %arg16[%c0_24, %c0_25, %c0_26] : memref<4x8x1xf32, #tpu.memory_space<vmem>>, vector<4x8x1xf32>
    tpu.vector_store %arg16[%c0_24, %c0_25, %c0_26], %34 {strides = array<i32>} : memref<4x8x1xf32, #tpu.memory_space<vmem>>, vector<4x8x1xf32>,
    %cst_27 = arith.constant 0.000000e+00 : f32
    %36 = vector.broadcast %cst_27 : f32 to vector<4x8x8xf32>
    %c0_28 = arith.constant 0 : index
    %c0_29 = arith.constant 0 : index
    %c0_30 = arith.constant 0 : index
    %37 = vector.load %arg17[%c0_28, %c0_29, %c0_30] : memref<4x8x8xf32, #tpu.memory_space<vmem>>, vector<4x8x8xf32>
    tpu.vector_store %arg17[%c0_28, %c0_29, %c0_30], %36 {strides = array<i32>} : memref<4x8x8xf32, #tpu.memory_space<vmem>>, vector<4x8x8xf32>,
    %c0_i32_31 = arith.constant 0 : i32
    %c8_i32_32 = arith.constant 8 : i32
    %38 = arith.muli %c0_i32_31, %c8_i32_32 : i32
    %39 = tpu.assume_multiple %38, 8 : i32
    %c0_33 = arith.constant 0 : index
    %40 = arith.index_cast %39 : i32 to index
    %c0_34 = arith.constant 0 : index
    %41 = vector.load %arg12[%c0_33, %40, %c0_34] : memref<4x8x8xf32, #tpu.memory_space<vmem>>, vector<4x8x8xf32>
    %c0_35 = arith.constant 0 : index
    %42 = arith.index_cast %39 : i32 to index
    %c0_36 = arith.constant 0 : index
    %43 = vector.load %arg13[%c0_35, %42, %c0_36] : memref<4x8x8xf32, #tpu.memory_space<vmem>>, vector<4x8x8xf32>
    "tpu.trace_start"() <{level = 10 : i32, message = "hqd,hkd->hqk"}> : () -> ()
    %cst_37 = arith.constant dense<0.000000e+00> : vector<4x8x8xf32>
    %44 = tpu.matmul %31, %41, %cst_37 {dimension_numbers = #tpu.dot_dimension_numbers<[2], [2], [1], [1], [0, 0, 0, 1, 1, 1], [0], [0]>} : vector<4x8x8xf32>, vector<4x8x8xf32>, vector<4x8x8xf32> -> vector<4x8x8xf32>
    "tpu.trace_stop"() : () -> ()
    %c0_38 = arith.constant 0 : index
    %c0_39 = arith.constant 0 : index
    %c0_40 = arith.constant 0 : index
    %45 = vector.load %arg15[%c0_38, %c0_39, %c0_40] : memref<4x8x1xf32, #tpu.memory_space<vmem>>, vector<4x8x1xf32>
    %cst_41 = arith.constant dense<0xFF800000> : vector<4x8xf32>
    %46 = vector.multi_reduction <maximumf>, %44, %cst_41 [2] : vector<4x8x8xf32> to vector<4x8xf32>
    %47 = vector.shape_cast %46 : vector<4x8xf32> to vector<4x8x1xf32>
    %48 = arith.maximumf %45, %47 : vector<4x8x1xf32>
    %49 = arith.subf %45, %48 : vector<4x8x1xf32>
    %50 = math.exp %49 : vector<4x8x1xf32>
    %51 = vector.broadcast %48 : vector<4x8x1xf32> to vector<4x8x8xf32>
    %52 = arith.subf %44, %51 : vector<4x8x8xf32>
    %53 = math.exp %52 : vector<4x8x8xf32>
    %c0_42 = arith.constant 0 : index
    %c0_43 = arith.constant 0 : index
    %c0_44 = arith.constant 0 : index
    %54 = vector.load %arg16[%c0_42, %c0_43, %c0_44] : memref<4x8x1xf32, #tpu.memory_space<vmem>>, vector<4x8x1xf32>
    %55 = arith.mulf %50, %54 : vector<4x8x1xf32>
    %cst_45 = arith.constant dense<0.000000e+00> : vector<4x8xf32>
    %56 = vector.multi_reduction <add>, %53, %cst_45 [2] : vector<4x8x8xf32> to vector<4x8xf32>
    %57 = vector.shape_cast %56 : vector<4x8xf32> to vector<4x8x1xf32>
    %58 = arith.addf %55, %57 : vector<4x8x1xf32>
    %c0_46 = arith.constant 0 : index
    %c0_47 = arith.constant 0 : index
    %c0_48 = arith.constant 0 : index
    %59 = vector.load %arg16[%c0_46, %c0_47, %c0_48] : memref<4x8x1xf32, #tpu.memory_space<vmem>>, vector<4x8x1xf32>
    tpu.vector_store %arg16[%c0_46, %c0_47, %c0_48], %58 {strides = array<i32>} : memref<4x8x1xf32, #tpu.memory_space<vmem>>, vector<4x8x1xf32>,
    %c0_49 = arith.constant 0 : index
    %c0_50 = arith.constant 0 : index
    %c0_51 = arith.constant 0 : index
    %60 = vector.load %arg17[%c0_49, %c0_50, %c0_51] : memref<4x8x8xf32, #tpu.memory_space<vmem>>, vector<4x8x8xf32>
    %61 = vector.broadcast %50 : vector<4x8x1xf32> to vector<4x8x8xf32>
    %62 = arith.mulf %61, %60 : vector<4x8x8xf32>
    "tpu.trace_start"() <{level = 10 : i32, message = "hqk,hkd->hqd"}> : () -> ()
    %cst_52 = arith.constant dense<0.000000e+00> : vector<4x8x8xf32>
    %63 = tpu.matmul %53, %43, %cst_52 {dimension_numbers = #tpu.dot_dimension_numbers<[2], [1], [1], [2], [0, 0, 0, 1, 1, 2], [0], [0]>} : vector<4x8x8xf32>, vector<4x8x8xf32>, vector<4x8x8xf32> -> vector<4x8x8xf32>
    "tpu.trace_stop"() : () -> ()
    %64 = arith.addf %62, %63 : vector<4x8x8xf32>
    %c0_53 = arith.constant 0 : index
    %c0_54 = arith.constant 0 : index
    %c0_55 = arith.constant 0 : index
    %65 = vector.load %arg17[%c0_53, %c0_54, %c0_55] : memref<4x8x8xf32, #tpu.memory_space<vmem>>, vector<4x8x8xf32>
    tpu.vector_store %arg17[%c0_53, %c0_54, %c0_55], %64 {strides = array<i32>} : memref<4x8x8xf32, #tpu.memory_space<vmem>>, vector<4x8x8xf32>,
    %c0_56 = arith.constant 0 : index
    %c0_57 = arith.constant 0 : index
    %c0_58 = arith.constant 0 : index
    %66 = vector.load %arg15[%c0_56, %c0_57, %c0_58] : memref<4x8x1xf32, #tpu.memory_space<vmem>>, vector<4x8x1xf32>
    tpu.vector_store %arg15[%c0_56, %c0_57, %c0_58], %48 {strides = array<i32>} : memref<4x8x1xf32, #tpu.memory_space<vmem>>, vector<4x8x1xf32>,
    %c1_i32 = arith.constant 1 : i32
    %c0_59 = arith.constant 0 : index
    %c0_60 = arith.constant 0 : index
    %c0_61 = arith.constant 0 : index
    %67 = vector.load %arg17[%c0_59, %c0_60, %c0_61] : memref<4x8x8xf32, #tpu.memory_space<vmem>>, vector<4x8x8xf32>
    %c0_62 = arith.constant 0 : index
    %c0_63 = arith.constant 0 : index
    %c0_64 = arith.constant 0 : index
    %68 = vector.load %arg16[%c0_62, %c0_63, %c0_64] : memref<4x8x1xf32, #tpu.memory_space<vmem>>, vector<4x8x1xf32>
    %69 = tpu.reciprocal %68 : vector<4x8x1xf32> -> vector<4x8x1xf32>
    %70 = vector.broadcast %69 : vector<4x8x1xf32> to vector<4x8x8xf32>
    %71 = arith.mulf %67, %70 : vector<4x8x8xf32>
    %72 = vector.extract_strided_slice %71 {offsets = [0, 0, 0], sizes = [1, 8, 8], strides = [1, 1, 1]} : vector<4x8x8xf32> to vector<1x8x8xf32>
    %73 = vector.shape_cast %72 : vector<1x8x8xf32> to vector<8x8xf32>
    %c0_65 = arith.constant 0 : index
    %c0_66 = arith.constant 0 : index
    %74 = vector.load %arg18[%c0_65, %c0_66] : memref<8x32xf32, #tpu.memory_space<vmem>>, vector<8x8xf32>
    tpu.vector_store %arg18[%c0_65, %c0_66], %73 {strides = array<i32>} : memref<8x32xf32, #tpu.memory_space<vmem>>, vector<8x8xf32>,
    %75 = vector.extract_strided_slice %71 {offsets = [1, 0, 0], sizes = [1, 8, 8], strides = [1, 1, 1]} : vector<4x8x8xf32> to vector<1x8x8xf32>
    %76 = vector.shape_cast %75 : vector<1x8x8xf32> to vector<8x8xf32>
    %c0_67 = arith.constant 0 : index
    %c8 = arith.constant 8 : index
    %77 = vector.load %arg18[%c0_67, %c8] : memref<8x32xf32, #tpu.memory_space<vmem>>, vector<8x8xf32>
    tpu.vector_store %arg18[%c0_67, %c8], %76 {strides = array<i32>} : memref<8x32xf32, #tpu.memory_space<vmem>>, vector<8x8xf32>,
    %78 = vector.extract_strided_slice %71 {offsets = [2, 0, 0], sizes = [1, 8, 8], strides = [1, 1, 1]} : vector<4x8x8xf32> to vector<1x8x8xf32>
    %79 = vector.shape_cast %78 : vector<1x8x8xf32> to vector<8x8xf32>
    %c0_68 = arith.constant 0 : index
    %c16 = arith.constant 16 : index
    %80 = vector.load %arg18[%c0_68, %c16] : memref<8x32xf32, #tpu.memory_space<vmem>>, vector<8x8xf32>
    tpu.vector_store %arg18[%c0_68, %c16], %79 {strides = array<i32>} : memref<8x32xf32, #tpu.memory_space<vmem>>, vector<8x8xf32>,
    %81 = vector.extract_strided_slice %71 {offsets = [3, 0, 0], sizes = [1, 8, 8], strides = [1, 1, 1]} : vector<4x8x8xf32> to vector<1x8x8xf32>
    %82 = vector.shape_cast %81 : vector<1x8x8xf32> to vector<8x8xf32>
    %c0_69 = arith.constant 0 : index
    %c24 = arith.constant 24 : index
    %83 = vector.load %arg18[%c0_69, %c24] : memref<8x32xf32, #tpu.memory_space<vmem>>, vector<8x8xf32>
    tpu.vector_store %arg18[%c0_69, %c24], %82 {strides = array<i32>} : memref<8x32xf32, #tpu.memory_space<vmem>>, vector<8x8xf32>,
    %c0_70 = arith.constant 0 : index
    %c0_71 = arith.constant 0 : index
    %84 = vector.load %arg18[%c0_70, %c0_71] : memref<8x32xf32, #tpu.memory_space<vmem>>, vector<8x32xf32>
    %c0_72 = arith.constant 0 : index
    %c0_73 = arith.constant 0 : index
    %85 = vector.load %arg9[%c0_72, %c0_73] : memref<32x32xf32, #tpu.memory_space<vmem>>, vector<32x32xf32>
    %cst_74 = arith.constant dense<0.000000e+00> : vector<8x32xf32>
    %86 = tpu.matmul %84, %85, %cst_74 {dimension_numbers = #tpu.dot_dimension_numbers<[1], [0], [0], [1], [0, 0, 1, 1], [], []>} : vector<8x32xf32>, vector<32x32xf32>, vector<8x32xf32> -> vector<8x32xf32>
    %c0_75 = arith.constant 0 : index
    %c0_76 = arith.constant 0 : index
    %87 = vector.load %arg10[%c0_75, %c0_76] : memref<1x32xf32, #tpu.memory_space<vmem>>, vector<1x32xf32>
    %88 = vector.broadcast %87 : vector<1x32xf32> to vector<8x32xf32>
    %89 = arith.addf %86, %88 : vector<8x32xf32>
    %c0_77 = arith.constant 0 : index
    %c0_78 = arith.constant 0 : index
    %c0_79 = arith.constant 0 : index
    %90 = vector.load %arg11[%c0_77, %c0_78, %c0_79] : memref<1x8x32xf32, #tpu.memory_space<vmem>>, vector<1x8x32xf32>
    %91 = vector.shape_cast %90 : vector<1x8x32xf32> to vector<8x32xf32>
    %92 = vector.shape_cast %89 : vector<8x32xf32> to vector<1x8x32xf32>
    tpu.vector_store %arg11[%c0_77, %c0_78, %c0_79], %92 {strides = array<i32>} : memref<1x8x32xf32, #tpu.memory_space<vmem>>, vector<1x8x32xf32>,
    return
  }
  func.func @transform_0(%arg0: i32, %arg1: i32) -> (i32, i32, i32) {
    %c0_i32 = arith.constant 0 : i32
    %c0_i32_0 = arith.constant 0 : i32
    %c0_i32_1 = arith.constant 0 : i32
    return %arg0, %c0_i32, %c0_i32_0 : i32, i32, i32
  }
  func.func @transform_1(%arg0: i32, %arg1: i32) -> (i32, i32) {
    %c0_i32 = arith.constant 0 : i32
    %c0_i32_0 = arith.constant 0 : i32
    %c0_i32_1 = arith.constant 0 : i32
    return %c0_i32, %c0_i32_0 : i32, i32
  }
  func.func @transform_2(%arg0: i32, %arg1: i32) -> (i32, i32) {
    %c0_i32 = arith.constant 0 : i32
    %c0_i32_0 = arith.constant 0 : i32
    %c0_i32_1 = arith.constant 0 : i32
    return %c0_i32, %c0_i32_0 : i32, i32
  }
  func.func @transform_3(%arg0: i32, %arg1: i32) -> (i32, i32) {
    %c0_i32 = arith.constant 0 : i32
    %c0_i32_0 = arith.constant 0 : i32
    %c0_i32_1 = arith.constant 0 : i32
    return %c0_i32, %c0_i32_0 : i32, i32
  }
  func.func @transform_4(%arg0: i32, %arg1: i32) -> (i32, i32) {
    %c0_i32 = arith.constant 0 : i32
    %c0_i32_0 = arith.constant 0 : i32
    %c0_i32_1 = arith.constant 0 : i32
    return %c0_i32, %c0_i32_0 : i32, i32
  }
  func.func @transform_5(%arg0: i32, %arg1: i32) -> (i32, i32) {
    %c0_i32 = arith.constant 0 : i32
    %c0_i32_0 = arith.constant 0 : i32
    %c0_i32_1 = arith.constant 0 : i32
    return %c0_i32, %c0_i32_0 : i32, i32
  }
  func.func @transform_6(%arg0: i32, %arg1: i32) -> (i32, i32) {
    %c0_i32 = arith.constant 0 : i32
    %c0_i32_0 = arith.constant 0 : i32
    %c0_i32_1 = arith.constant 0 : i32
    return %c0_i32, %c0_i32_0 : i32, i32
  }
  func.func @transform_7(%arg0: i32, %arg1: i32) -> (i32, i32) {
    %c0_i32 = arith.constant 0 : i32
    %c0_i32_0 = arith.constant 0 : i32
    %c0_i32_1 = arith.constant 0 : i32
    return %c0_i32, %c0_i32_0 : i32, i32
  }
  func.func @transform_8(%arg0: i32, %arg1: i32) -> (i32, i32) {
    %c0_i32 = arith.constant 0 : i32
    %c0_i32_0 = arith.constant 0 : i32
    %c0_i32_1 = arith.constant 0 : i32
    return %c0_i32, %c0_i32_0 : i32, i32
  }
  func.func @transform_9(%arg0: i32, %arg1: i32) -> (i32, i32, i32) {
    %c0_i32 = arith.constant 0 : i32
    %c0_i32_0 = arith.constant 0 : i32
    return %arg0, %arg1, %c0_i32 : i32, i32, i32
  }
}

</mosaic_0001>

<bundles_post_ra>
// kernel: tpu_custom_call.1
= control target key start
LH: loop header
LB: loop body
LE: loop exit
PB: predicated region body
PF: predicated region fallthrough
CT: control target
= control target key end

     0   :  { %s1997_s0 = inlined_call_operand.hbm [shape: f32[2,8,32], index: 0, kind: input, shape index: {}]   ;;  %s1998_s1 = inlined_call_operand.hbm [shape: f32[32,32], index: 1, kind: input, shape index: {}]   ;;  %s1999_s2 = inlined_call_operand.hbm [shape: f32[32,32], index: 2, kind: input, shape index: {}]   ;;  %s2000_s3 = inlined_call_operand.hbm [shape: f32[32,32], index: 3, kind: input, shape index: {}]   ;;  %s2001_s4 = inlined_call_operand.vmem [shape: f32[1,32], index: 4, kind: input, shape index: {}]   ;;  %s2002_s5 = inlined_call_operand.vmem [shape: f32[1,32], index: 5, kind: input, shape index: {}]   ;;  %s2003_s6 = inlined_call_operand.vmem [shape: f32[1,32], index: 6, kind: input, shape index: {}]   ;;  %s2004_s7 = inlined_call_operand.hbm [shape: f32[32,32], index: 7, kind: input, shape index: {}]   ;;  %s2005_s8 = inlined_call_operand.vmem [shape: f32[1,32], index: 8, kind: input, shape index: {}]   ;;  %s2006_s9 = inlined_call_operand.hbm [shape: f32[2,8,32], index: 9, kind: output, shape index: {}]  }
   0x1   :  { %2008 = sst [smem:[#allocation23_spill]] %s1998_s1 }
   0x2   :  { %2009 = sst [smem:[#allocation24_spill]] %s1999_s2 }
   0x3   :  { %2010 = sst [smem:[#allocation25_spill]] %s2000_s3 }
   0x4   :  { %14 = vsyncpa [#allocation10], 0 }
   0x5   :  { %16 = vsyncpa [#allocation10 + $0x1], 0 }
   0x6   :  { %17 = vsyncpa [#allocation13], 0 }
   0x7   :  { %18 = vsyncpa [#allocation16], 0 }
   0x8   :  { %19 = vsyncpa [#allocation11], 0 }
   0x9   :  { %21 = vsyncpa [#allocation11 + $0x1], 0  ;;  %s1702_s30 = smov 0   ;;  %s1704_s10 = smov 0  }
   0xa   :  { %s1706_s11 = smov 0   ;;  %s1708_s12 = smov 0  }
   0xb   :  { %s1710_s13 = smov 0   ;;  %s1712_s14 = smov 0  }
   0xc LB: > { %s2007_s15 = sadd.s32 4294967295, %s1635_s14   ;;  %p1215_p0 = scmp.ge.s32.totalorder %s1635_s14, 1  ;;  %s1635_s14 = sphi %s1712_s14, %s27_s14   ;;  %s1631_s13 = sphi %s1710_s13, %s2025_s13   ;;  %s1627_s12 = sphi %s1708_s12, %s2024_s12   ;;  %s1623_s11 = sphi %s1706_s11, %s2023_s11   ;;  %s1619_s10 = sphi %s1704_s10, %s2022_s10   ;;  %s1615_s30 = sphi %s1702_s30, %s2021_s30  }
   0xd   : > { %p1736_p1 = scmp.eq.s32.totalorder %s2007_s15, 0  ;;  %p266_p2 = scmp.lt.s32.totalorder %s1635_s14, 3 }
   0xe   : > { %s2012_s1 = sld [smem:[#allocation23_spill]]  ;;  %s1637_s21 = smov [#allocation12]  }
   0xf   : > { %p1744_p3 = pnand %p1215_p0, %p266_p2  ;;  %s279_s22 = sshll.u32 %s1637_s21, 4  ;;  %s280_s22 = int_to_ptr.vmem [resolvable:$true] %s279_s22 }
  0x10   : > { %p1220_p6 = scmp.ge.s32.totalorder %s1635_s14, 2  ;;  %s2015_s3 = sld [smem:[#allocation25_spill]] }
  0x11   : > { %p1270_p4 = pneg %p1744_p3  ;;  %s1638_s27 = smov 128  }
  0x12   : > { %s1639_s28 = smov 8   ;;  %s1640_s29 = smov [#allocation15]  }
  0x13   : > { %p1752_p5 = pnand %p1270_p4, %p1736_p1  ;;  %s307_s17 = sshll.u32 %s1640_s29, 4  ;;  %s308_s17 = int_to_ptr.vmem [resolvable:$true] %s307_s17 }
  0x14   : > { %s277_s19 = sshll.u32 %s2012_s1, 4  ;;  %s2016_s2 = sld [smem:[#allocation24_spill]]  ;;  %s278_s19 = int_to_ptr.hbm [resolvable:$true] %s277_s19 }
  0x15   : > { %1273 = dma.hbm_to_vmem [thread:$0]  (!%p1752_p5), %s278_s19, 512, %s280_s22, [#allocation13], %s1638_s27, %s1638_s27, %s1639_s28  }
  0x16   : > { %s305_s26 = sshll.u32 %s2015_s3, 4  ;;  %s328_s19 = sshll.u32 %s2004_s7, 4  ;;  %s306_s26 = int_to_ptr.hbm [resolvable:$true] %s305_s26  ;;  %s329_s19 = int_to_ptr.hbm [resolvable:$true] %s328_s19 }
  0x17   : > { %1279 = dma.hbm_to_vmem [thread:$0]  (!%p1752_p5), %s306_s26, 512, %s308_s17, [#allocation16], %s1638_s27, %s1638_s27, %s1639_s28  }
  0x18   : > { %s1641_s22 = smov [#allocation14]   ;;  %s1642_s18 = smov [#allocation17]  }
  0x19   : > { %s293_s29 = sshll.u32 %s1641_s22, 4  ;;  %s330_s21 = sshll.u32 %s1642_s18, 4  ;;  %s294_s29 = int_to_ptr.vmem [resolvable:$true] %s293_s29  ;;  %s331_s21 = int_to_ptr.vmem [resolvable:$true] %s330_s21 }
  0x1a   : > { %s291_s15 = sshll.u32 %s2016_s2, 4  ;;  %s39_s26 = sadd.s32 1, %s1631_s13  ;;  %s292_s15 = int_to_ptr.hbm [resolvable:$true] %s291_s15 }
  0x1b   : > { %1276 = dma.hbm_to_vmem [thread:$0]  (!%p1752_p5), %s292_s15, 512, %s294_s29, [#allocation13], %s1638_s27, %s1638_s27, %s1639_s28  }
  0x1c   : > { %1282 = dma.hbm_to_vmem [thread:$0]  (!%p1752_p5), %s329_s19, 512, %s331_s21, [#allocation16], %s1638_s27, %s1638_s27, %s1639_s28  }
  0x1d   : > { %s1214_s17 = sadd.s32 4294967294, %s1635_s14   ;;  %p41_p7 = scmp.ge.s32.totalorder %s39_s26, 2 }
  0x1e   : > { %s46_s24 = sadd.s32 1, %s1623_s11  ;;  %p53_p8 = scmp.ne.s32.totalorder %s1623_s11, %s1619_s10 }
  0x1f   : > { %s2027_s26 = smov (%p41_p7, %s39_s26), 0  ;;  %p54_p9 = scmp.eq.s32.totalorder %s1635_s14, 0 }
  0x20   : > { %p59_p10 = scmp.ne.s32.totalorder %s1619_s10, %s1615_s30  ;;  %s43_s15 = ssub.s32 %s1631_s13, %s2027_s26 }
  0x21   : > { %s2017_s25 = sadd.s32 4294967295, %s1635_s14   ;;  %p44_p12 = scmp.eq.s32.totalorder %s43_s15, 0 }
  0x22   : > { %p253_p11 = scmp.eq.s32.totalorder %s2017_s25, 1  ;;  %p1790_p13 = por %p1736_p1, %p59_p10 }
  0x23   : > { %p259_p2 = scmp.eq.s32.totalorder %s1214_s17, 1  ;;  %p55_p4 = por %p54_p9, %p53_p8 }
  0x24   : > { %p1794_p0 = por %p253_p11, %p53_p8  ;;  %s347_s22 = sand.u32 1, %s1623_s11  }
  0x25   : > { %s1799_s28 = scalar_select %p44_p12, %s1623_s11, %s46_s24  }
  0x26   : > { %p1801_p5 = por %p259_p2, %p59_p10  ;;  %s1222_s29 = sshll.u32 %s1631_s13, 3 }
  0x27   : > { %p1295_p7 = scmp.lt.s32.totalorder %s1635_s14, 2  ;;  %s1221_s18 = sshll.u32 %s347_s22, 3 }
  0x28   : > { %s355_s25 = scalar_lea.hbm %s1997_s0, %s1222_s29  ;;  %s351_s2 = scalar_lea.vmem [#allocation9], %s1221_s18 }
  0x29   : > { %s357_s1 = sshll.u32 %s355_s25, 4  ;;  %s359_s3 = sshll.u32 %s351_s2, 4  ;;  %s358_s1 = int_to_ptr.hbm [resolvable:$true] %s357_s1  ;;  %s360_s3 = int_to_ptr.vmem [resolvable:$true] %s359_s3 }
  0x2a   : > { %p1284_p11 = pnand %p1295_p7, %p55_p4  ;;  %s348_s17 = scalar_lea.sflag [#allocation10], %s347_s22 }
  0x2b   : > { %368 = sbr.rel (%p1744_p3) target bundleno = 1197 (0x4ad), region = 56  ;;  %s1814_s24 = sand.u32 (!%p1744_p3), 1, %s1619_s10  }
  0x2c   : > { %1286 = dma.hbm_to_vmem [thread:$0]  (!%p1284_p11), %s358_s1, 128, %s360_s3, %s348_s17  }
  0x2d   : > { %s1224_s21 = sshll.u32 (!%p1744_p3), %s1814_s24, 3  ;;  %s371_s29 = scalar_lea.sflag (!%p1744_p3), [#allocation10], %s1814_s24 }
  0x2e   : > { %s374_s18 = scalar_lea.vmem (!%p1744_p3), [#allocation9], %s1224_s21 }
  0x30   : > { %1598 = dma.done.wait (%p1790_p13), %s371_s29, 128  }
  0x31   : > { %1600 = vsyncadd (%p1790_p13), %s371_s29, 4294967168 }
  0x32   : > { %1602 = dma.done.wait (%p1736_p1), [#allocation13], 1024  }
  0x33   : > { %1604 = vsyncadd (%p1736_p1), [#allocation13], 4294966272 }
  0x34   : > { %1606 = dma.done.wait (%p1736_p1), [#allocation16], 1024  }
  0x35   : > { %1608 = vsyncadd (%p1736_p1), [#allocation16], 4294966272  ;;  %v438_v0 = vld [vmem:[#allocation14 + $0x18] sm:$0xff]  ;;  %v437_v2 = vld [vmem:[#allocation14 + $0x10] sm:$0xff]  ;;  %vm443_vm0 = vcmask 261120   ;;  %vm495_vm1 = vcmask 64512  }
  0x36   : > { %v536_v1 = vld [vmem:[#allocation12 + $0x18] sm:$0xff]  ;;  %459 = vmatpush.msra.mxu0 %v438_v0  ;;  %v535_v3 = vld [vmem:[#allocation12 + $0x10] sm:$0xff]  ;;  %v436_v4 = vld [vmem:[#allocation14 + $0x8] sm:$0xff]  ;;  %s1643_s3 = smov 112   ;;  %s1644_s16 = smov 120   ;;  %vm588_vm2 = vcmask 7168  }
  0x37   : > { %557 = vmatpush.msra.mxu2 %v536_v1  ;;  %v534_v5 = vld [vmem:[#allocation12 + $0x8] sm:$0xff]  ;;  %v435_v6 = vld [vmem:[#allocation14] sm:$0xff]  ;;  %v434_v8 = vld [vmem:[%s374_s18] sm:$0xff]  ;;  %s1645_s22 = smov 104   ;;  %v1646_v39 = vmov -1e+30  }
  0x38   : > { %460 = vmatpush.msra.mxu0 %v437_v2  ;;  %v533_v7 = vld [vmem:[#allocation12] sm:$0xff]  ;;  %v1367_v9 = vld [vmem:[%s2002_s5] ss:$0 sm:$0xff]  ;;  %v470_v18 = vld [vmem:[#allocation15 + $0x18] sm:$0xff]  ;;  %589 = vst.msk [vmem:[#allocation5] sm:$0xff] %vm588_vm2, %v1646_v39  ;;  %v1647_v41 = vmov 0.0  }
  0x39   : > { %558 = vmatpush.msra.mxu2 %v535_v3  ;;  %v1368_v12 = vld [vmem:[%s2001_s4] ss:$0 sm:$0xff]  ;;  %v469_v19 = vld [vmem:[#allocation15 + $0x10] sm:$0xff]  ;;  %487 = vmatpush.msra.mxu1 %v470_v18  ;;  %v467_v21 = vld [vmem:[#allocation15] sm:$0xff]  ;;  %590 = vst.msk [vmem:[#allocation5 + $0x8] sm:$0xff] %vm588_vm2, %v1646_v39  ;;  %v1648_v51 = vmov 0  }
  0x3a   : > { %461 = vmatpush.msra.mxu0 %v436_v4  ;;  %v468_v20 = vld [vmem:[#allocation15 + $0x8] sm:$0xff]  ;;  %591 = vst.msk [vmem:[#allocation5 + $0x10] sm:$0xff] %vm588_vm2, %v1646_v39  ;;  %1365 = vset.pattern.permute.xlu2 %v1648_v51  ;;  %s1649_s17 = smov 16   ;;  %s1650_s29 = smov 24  }
  0x3b   : > { %559 = vmatpush.msra.mxu2 %v534_v5  ;;  %488 = vmatpush.msra.mxu1 %v469_v19  ;;  %v1369_v36 = vld [vmem:[%s2003_s6] ss:$0 sm:$0xff]  ;;  %592 = vst.msk [vmem:[#allocation5 + $0x18] sm:$0xff] %vm588_vm2, %v1646_v39  ;;  %s1651_s18 = smov 8   ;;  %s1247_s1 = sshll.u32 %s1627_s12, 3 }
  0x3c   : > { %462 = vmatpush.msra.mxu0 %v435_v6  ;;  %595 = vst.msk [vmem:[#allocation6 + $0x10] sm:$0xff] %vm588_vm2, %v1647_v41  ;;  %1366 = vset.pattern.permute.xlu1 %v1648_v51  ;;  %s1078_s12 = scalar_lea.sflag [#allocation11], %s1814_s24 }
  0x3d   : > { %560 = vmatpush.msra.mxu2 %v533_v7  ;;  %1230 = vmatmul.msk.f32.vlgmr.msra.gmra.mxu0 %vm443_vm0, %v434_v8  ;;  %593 = vst.msk [vmem:[#allocation6] sm:$0xff] %vm588_vm2, %v1647_v41 }
  0x3e   : > { %1232 = vmatmul.msk.f32.vlgmr.msra.gmra.mxu2 %vm443_vm0, %v434_v8  ;;  %489 = vmatpush.msra.mxu1 %v468_v20  ;;  %594 = vst.msk [vmem:[#allocation6 + $0x8] sm:$0xff] %vm588_vm2, %v1647_v41 }
  0x3f   : > { %596 = vst.msk [vmem:[#allocation6 + $0x18] sm:$0xff] %vm588_vm2, %v1647_v41  ;;  %v1885_v46 = vld [vmem:[#allocation5] sm:$0xff]  ;;  %1364 = vset.pattern.permute.xlu0 %v1648_v51 }
  0x40   : > { %490 = vmatpush.msra.mxu1 %v467_v21  ;;  %597 = vst.msk [vmem:[#allocation7] sm:$0xff] %vm495_vm1, %v1647_v41  ;;  %v714_v59 = vld [vmem:[#allocation5 + $0x8] sm:$0xff] }
  0x41   : > { %1231 = vmatmul.msk.f32.vlgmr.msra.gmra.mxu1 %vm443_vm0, %v434_v8  ;;  %598 = vst.msk [vmem:[#allocation7 + $0x8] sm:$0xff] %vm495_vm1, %v1647_v41  ;;  %v1897_v52 = vld [vmem:[#allocation5 + $0x10] sm:$0xff] }
  0x42   : > { %599 = vst.msk [vmem:[#allocation7 + $0x10] sm:$0xff] %vm495_vm1, %v1647_v41  ;;  %v1907_v56 = vld [vmem:[#allocation5 + $0x18] sm:$0xff] }
  0x43   : > { %600 = vst.msk [vmem:[#allocation7 + $0x18] sm:$0xff] %vm495_vm1, %v1647_v41 }
  0xba   : > { %v464_v10 = vpop.f32.mrf.mxu0 }
  0xbb   : > { %v465_v11 = vadd.f32 %v1367_v9, %v464_v10 }
  0xbd   : > { %496 = vst.msk [vmem:[#allocation2] sm:$0xff] %vm495_vm1, %v465_v11  ;;  %510 = vrot.lane.b32.xlu1 %v465_v11, %s1643_s3  ;;  %499 = vrot.lane.b32.xlu0 %v465_v11, %s1644_s16 }
  0xbe   : > { %v492_v37 = vpop.f32.mrf.mxu1 }
  0xbf   : > { %v493_v38 = vadd.f32 %v1369_v36, %v492_v37 }
  0xc1   : > { %v562_v13 = vpop.f32.mrf.mxu2  ;;  %497 = vst.msk [vmem:[#allocation3] sm:$0xff] %vm495_vm1, %v493_v38 }
  0xc2   : > { %v563_v14 = vadd.f32 %v1368_v12, %v562_v13 }
  0xc4   : > { %v565_v15 = vmul.f32 0.35355338, %v563_v14  ;;  %v601_v16 = vld [vmem:[#allocation2] sm:$0xff] }
  0xc5   : > { %520 = vrot.lane.b32.xlu1 %v465_v11, %s1645_s22  ;;  %1233 = vmatpush.xpose.msk.msra.mxu3 %vm495_vm1, %v601_v16 }
  0xc6   : > { %567 = vst.msk [vmem:[#allocation4] sm:$0xff] %vm495_vm1, %v565_v15  ;;  %574 = vrot.lane.b32.xlu2 %v565_v15, %s1643_s3  ;;  %569 = vrot.lane.b32.xlu0 %v565_v15, %s1644_s16 }
  0xc8   : > { %v605_v40 = vld [vmem:[#allocation3] sm:$0xff] }
  0xc9   : > { %851 = vmatpush.msrb.mxu2 %v605_v40 }
  0xcd   : > { %v584_v17 = vld [vmem:[#allocation4] sm:$0xff] }
  0xce   : > { %579 = vrot.lane.b32.xlu2 %v565_v15, %s1645_s22  ;;  %1234 = vmatmul.msk.f32.vlgmr.msra.gmra.mxu3 %vm495_vm1, %v584_v17 }
 0x120   : > { %v575_v22 = vpop.permute.xlu2 %574 }
 0x121   : > { %578 = vst.msk [vmem:[#allocation4 + $0x10] sm:$0xff] %vm495_vm1, %v575_v22 }
 0x128   : > { %v580_v23 = vpop.permute.xlu2 %579  ;;  %v586_v30 = vld [vmem:[#allocation4 + $0x10] sm:$0xff] }
 0x129   : > { %583 = vst.msk [vmem:[#allocation4 + $0x18] sm:$0xff] %vm495_vm1, %v580_v23 }
 0x12f   : > { %v511_v24 = vpop.permute.xlu1 %510  ;;  %v500_v25 = vpop.permute.xlu0 %499 }
 0x130   : > { %514 = vst.msk [vmem:[#allocation2 + $0x10] sm:$0xff] %vm495_vm1, %v511_v24  ;;  %v587_v33 = vld [vmem:[#allocation4 + $0x18] sm:$0xff] }
 0x131   : > { %503 = vst.msk [vmem:[#allocation2 + $0x8] sm:$0xff] %vm495_vm1, %v500_v25 }
 0x137   : > { %v521_v26 = vpop.permute.xlu1 %520  ;;  %v603_v27 = vld [vmem:[#allocation2 + $0x10] sm:$0xff] }
 0x138   : > { %524 = vst.msk [vmem:[#allocation2 + $0x18] sm:$0xff] %vm495_vm1, %v521_v26  ;;  %v570_v28 = vpop.permute.xlu0 %569  ;;  %v602_v29 = vld [vmem:[#allocation2 + $0x8] sm:$0xff]  ;;  %1237 = vmatpush.xpose.msk.msrb.mxu0 %vm495_vm1, %v603_v27 }
 0x139   : > { %573 = vst.msk [vmem:[#allocation4 + $0x8] sm:$0xff] %vm495_vm1, %v570_v28  ;;  %1235 = vmatpush.xpose.msk.msrb.mxu3 %vm495_vm1, %v602_v29 }
 0x13b   : > { %1238 = vmatmul.msk.f32.vlgmr.msrb.gmra.mxu0 %vm495_vm1, %v586_v30 }
 0x13f   : > { %v604_v31 = vld [vmem:[#allocation2 + $0x18] sm:$0xff] }
 0x140   : > { %v585_v32 = vld [vmem:[#allocation4 + $0x8] sm:$0xff]  ;;  %1239 = vmatpush.xpose.msk.msrb.mxu1 %vm495_vm1, %v604_v31 }
 0x141   : > { %1236 = vmatmul.msk.f32.vlgmr.msrb.gmra.mxu3 %vm495_vm1, %v585_v32  ;;  %v779_v32 = vld [vmem:[#allocation6 + $0x10] sm:$0xff] }
 0x143   : > { %1240 = vmatmul.msk.f32.vlgmr.msrb.gmra.mxu1 %vm495_vm1, %v587_v33 }
 0x151   : > { %v1863_v34 = vpop.f32.mrf.mxu3 }
 0x152   : > { %v717_v35 = vsel %vm495_vm1, %v1863_v34, -inf }
 0x153   : > { %718 = vmax.xlane.f32.xlu2 %v717_v35 }
 0x1b8   : > { %v684_v42 = vpop.f32.mrf.mxu0 }
 0x1b9   : > { %v723_v43 = vsel %vm495_vm1, %v684_v42, -inf }
 0x1ba   : > { %724 = vmax.xlane.f32.xlu1 %v723_v43 }
 0x1c0   : > { %v710_v44 = vpop.f32.mrf.mxu1 }
 0x1c1   : > { %v726_v45 = vsel %vm495_vm1, %v710_v44, -inf }
 0x1c2   : > { %727 = vmax.xlane.f32.xlu2 %v726_v45 }
 0x1c4   : > { %v1887_v47 = vpop.f32.mrf.mxu3 }
 0x1c5   : > { %v720_v49 = vsel %vm495_vm1, %v1887_v47, -inf }
 0x1c6   : > { %v719_v48 = vpop.xlane.xlu2 %718  ;;  %721 = vmax.xlane.f32.xlu0 %v720_v49  ;;  %v780_v49 = vld [vmem:[#allocation6 + $0x18] sm:$0xff] }
 0x1c7   : > { %v1892_v50 = vmax.f32 %v1885_v46, %v719_v48 }
 0x1c9   : > { %933 = vst.msk [vmem:[#allocation5] sm:$0xff] %vm588_vm2, %v1892_v50  ;;  %v733_v45 = vsub.f32 %v1885_v46, %v1892_v50 }
 0x1cb   : > { %v737_v51 = vmul.f32 1.442695, %v733_v45 }
 0x1d3   : > { %505 = vrot.lane.b32.xlu1 %v493_v38, %s1644_s16  ;;  %s1089_s16 = scalar_lea.hbm %s2006_s9, %s1247_s1 }
 0x1d4   : > { %s1093_s25 = sshll.u32 %s1089_s16, 4  ;;  %s1094_s25 = int_to_ptr.hbm [resolvable:$true] %s1093_s25 }
 0x22d   : > { %v725_v53 = vpop.xlane.xlu1 %724 }
 0x22e   : > { %v1900_v54 = vmax.f32 %v1897_v52, %v725_v53 }
 0x230   : > { %v735_v55 = vsub.f32 %v1897_v52, %v1900_v54  ;;  %935 = vst.msk [vmem:[#allocation5 + $0x10] sm:$0xff] %vm588_vm2, %v1900_v54  ;;  %757 = vperm.xlu2 %1365, %v1900_v54   ;;  %v778_v54 = vld [vmem:[#allocation6 + $0x8] sm:$0xff] }
 0x232   : > { %v741_v28 = vmul.f32 1.442695, %v735_v55 }
 0x235   : > { %v728_v57 = vpop.xlane.xlu2 %727 }
 0x236   : > { %v1910_v58 = vmax.f32 %v1907_v56, %v728_v57 }
 0x238   : > { %v736_v60 = vsub.f32 %v1907_v56, %v1910_v58  ;;  %936 = vst.msk [vmem:[#allocation5 + $0x18] sm:$0xff] %vm588_vm2, %v1910_v58  ;;  %515 = vrot.lane.b32.xlu2 %v493_v38, %s1643_s3  ;;  %762 = vperm.xlu1 %1366, %v1910_v58  }
 0x239   : > { %v722_v61 = vpop.xlane.xlu0 %721 }
 0x23a   : > { %v730_v62 = vmax.f32 %v714_v59, %v722_v61  ;;  %v743_v29 = vmul.f32 1.442695, %v736_v60  ;;  %v777_v60 = vld [vmem:[#allocation6] sm:$0xff] }
 0x23c   : > { %v734_v63 = vsub.f32 %v714_v59, %v730_v62  ;;  %934 = vst.msk [vmem:[#allocation5 + $0x8] sm:$0xff] %vm588_vm2, %v730_v62  ;;  %752 = vperm.xlu0 %1364, %v730_v62   ;;  %v807_v59 = vld [vmem:[#allocation7 + $0x10] sm:$0xff] }
 0x23e   : > { %v739_v13 = vmul.f32 1.442695, %v734_v63 }
 0x240   : > { %747 = vperm.xlu2 %1365, %v1892_v50   ;;  %525 = vrot.lane.b32.xlu1 %v493_v38, %s1645_s22  ;;  %s429_s22 = scalar_lea.vmem [#allocation18], %s1224_s21  ;;  %s1565_s21 = scalar_lea.hbm %s2006_s9, 16 }
 0x241   : > { %s1091_s15 = sshll.u32 %s429_s22, 4  ;;  %s1092_s15 = int_to_ptr.vmem [resolvable:$true] %s1091_s15 }
 0x245   : > { %v506_v0 = vpop.permute.xlu1 %505 }
 0x246   : > { %509 = vst.msk [vmem:[#allocation3 + $0x8] sm:$0xff] %vm495_vm1, %v506_v0 }
 0x24d   : > { %v606_v1 = vld [vmem:[#allocation3 + $0x8] sm:$0xff] }
 0x24e   : > { %874 = vmatpush.msra.mxu3 %v606_v1 }
 0x28a   : > { %v758_v2 = vpop.permute.xlu2 %757 }
 0x28b   : > { %v767_v3 = vsub.f32 %v684_v42, %v758_v2 }
 0x28d   : > { %v773_v4 = vmul.f32 1.442695, %v767_v3 }
 0x28f   : > { %1371 = vpow2.f32 %v773_v4 }
 0x292   : > { %v516_v5 = vpop.permute.xlu2 %515 }
 0x293   : > { %519 = vst.msk [vmem:[#allocation3 + $0x10] sm:$0xff] %vm495_vm1, %v516_v5  ;;  %v806_v5 = vld [vmem:[#allocation7 + $0x8] sm:$0xff] }
 0x295   : > { %v1372_v6 = vpop.eup %1371 }
 0x296   : > { %v791_v7 = vsel %vm495_vm1, %v1372_v6, 0.0 }
 0x297   : > { %792 = vadd.xlane.f32.xlu1 %v791_v7 }
 0x29a   : > { %v748_v8 = vpop.permute.xlu2 %747  ;;  %v607_v9 = vld [vmem:[#allocation3 + $0x10] sm:$0xff] }
 0x29b   : > { %v765_v10 = vsub.f32 %v1863_v34, %v748_v8  ;;  %897 = vmatpush.msra.mxu0 %v607_v9 }
 0x29c   : > { %1243 = vmatmul.msk.f32.vlgmr.msra.gmra.mxu0 %vm495_vm1, %v1372_v6 }
 0x29d   : > { %v769_v11 = vmul.f32 1.442695, %v765_v10 }
 0x29f   : > { %1373 = vpow2.f32 %v769_v11 }
 0x2a0   : > { %1375 = vpow2.f32 %v739_v13 }
 0x2a5   : > { %v1374_v12 = vpop.eup %1373 }
 0x2a6   : > { %1241 = vmatmul.msk.f32.vlgmr.msrb.gmra.mxu2 %vm495_vm1, %v1374_v12  ;;  %v1376_v18 = vpop.eup %1375  ;;  %v785_v27 = vsel %vm495_vm1, %v1374_v12, 0.0 }
 0x2a7   : > { %v782_v56 = vmul.f32 %v1376_v18, %v778_v54 }
 0x2aa   : > { %v763_v14 = vpop.permute.xlu1 %762 }
 0x2ab   : > { %v768_v15 = vsub.f32 %v710_v44, %v763_v14 }
 0x2ad   : > { %v775_v16 = vmul.f32 1.442695, %v768_v15 }
 0x2ae   : > { %v753_v17 = vpop.permute.xlu0 %752 }
 0x2af   : > { %1377 = vpow2.f32 %v775_v16  ;;  %v766_v19 = vsub.f32 %v1887_v47, %v753_v17 }
 0x2b0   : > { %816 = vperm.xlu1 %1366, %v1376_v18  }
 0x2b1   : > { %v771_v20 = vmul.f32 1.442695, %v766_v19 }
 0x2b2   : > { %v526_v21 = vpop.permute.xlu1 %525 }
 0x2b3   : > { %1379 = vpow2.f32 %v771_v20  ;;  %529 = vst.msk [vmem:[#allocation3 + $0x18] sm:$0xff] %vm495_vm1, %v526_v21 }
 0x2b4   : > { %1381 = vpow2.f32 %v741_v28 }
 0x2b5   : > { %v1378_v22 = vpop.eup %1377  ;;  %1383 = vpow2.f32 %v743_v29  ;;  %v808_v29 = vld [vmem:[#allocation7 + $0x18] sm:$0xff] }
 0x2b6   : > { %v794_v23 = vsel %vm495_vm1, %v1378_v22, 0.0 }
 0x2b7   : > { %795 = vadd.xlane.f32.xlu2 %v794_v23 }
 0x2b9   : > { %v1380_v24 = vpop.eup %1379 }
 0x2ba   : > { %1242 = vmatmul.msk.f32.vlgmr.msra.gmra.mxu3 %vm495_vm1, %v1380_v24  ;;  %v788_v25 = vsel %vm495_vm1, %v1380_v24, 0.0  ;;  %v608_v26 = vld [vmem:[#allocation3 + $0x18] sm:$0xff]  ;;  %v1382_v30 = vpop.eup %1381 }
 0x2bb   : > { %789 = vadd.xlane.f32.xlu0 %v788_v25  ;;  %920 = vmatpush.msra.mxu1 %v608_v26  ;;  %v1384_v31 = vpop.eup %1383  ;;  %v783_v33 = vmul.f32 %v1382_v30, %v779_v32 }
 0x2bc   : > { %1244 = vmatmul.msk.f32.vlgmr.msra.gmra.mxu1 %vm495_vm1, %v1378_v22  ;;  %v784_v52 = vmul.f32 %v1384_v31, %v780_v49 }
 0x2c3   : > { %786 = vadd.xlane.f32.xlu0 %v785_v27 }
 0x2cf   : > { %821 = vperm.xlu2 %1365, %v1382_v30  }
 0x2d7   : > { %826 = vperm.xlu0 %1364, %v1384_v31  }
 0x30a   : > { %v793_v34 = vpop.xlane.xlu1 %792 }
 0x30b   : > { %v799_v35 = vadd.f32 %v793_v34, %v783_v33 }
 0x30d   : > { %803 = vst.msk [vmem:[#allocation6 + $0x10] sm:$0xff] %vm588_vm2, %v799_v35 }
 0x314   : > { %v943_v36 = vld [vmem:[#allocation6 + $0x10] sm:$0xff] }
 0x315   : > { %1385 = vrcp.f32 %v943_v36  ;;  %v984_v40 = vand.u32 2147483648, %v943_v36  ;;  %v982_v42 = vand.u32 2147483647, %v943_v36  ;;  %vm978_vm4 = vweird.f32 %v943_v36 }
 0x316   : > { %1387 = vpow2.f32 %v737_v51 }
 0x317   : > { %v985_v44 = vor.u32 1.1754944e-38, %v984_v40  ;;  %vm983_vm6 = vcmp.eq.f32.partialorder %v982_v42, 8.507059e+37 }
 0x319   : > { %v899_v62 = vpop.f32.mrf.mxu0 }
 0x31b   : > { %v1386_v37 = vpop.eup %1385 }
 0x31c   : > { %v974_v38 = vmul.f32 %v1386_v37, %v943_v36  ;;  %vm979_vm3 = vweird.f32 %v1386_v37  ;;  %v1942_v46 = vpop.eup %1387 }
 0x31d   : > { %vm980_vm5 = vmor %vm978_vm4, %vm979_vm3  ;;  %v781_v1 = vmul.f32 %v1942_v46, %v777_v60 }
 0x31e   : > { %v975_v39 = vsub.f32 1.0, %v974_v38 }
 0x320   : > { %v976_v41 = vmul.f32 %v1386_v37, %v975_v39 }
 0x322   : > { %v977_v43 = vadd.f32 %v1386_v37, %v976_v41  ;;  %v817_v6 = vpop.permute.xlu1 %816 }
 0x323   : > { %v830_v8 = vmul.f32 %v817_v6, %v806_v5 }
 0x324   : > { %v981_v47 = vsel %vm980_vm5, %v1386_v37, %v977_v43  ;;  %vm1030_vm5 = vcmask 130112  }
 0x325   : > { %v986_v48 = vsel %vm983_vm6, %v985_v44, %v981_v47  ;;  %vm1036_vm6 = vcmask 195712  }
 0x326   : > { %1013 = vperm.xlu0 %1364, %v986_v48  }
 0x32a   : > { %v796_v53 = vpop.xlane.xlu2 %795 }
 0x32b   : > { %v800_v55 = vadd.f32 %v796_v53, %v784_v52 }
 0x32d   : > { %804 = vst.msk [vmem:[#allocation6 + $0x18] sm:$0xff] %vm588_vm2, %v800_v55 }
 0x32e   : > { %v790_v57 = vpop.xlane.xlu0 %789 }
 0x32f   : > { %v798_v58 = vadd.f32 %v790_v57, %v782_v56  ;;  %v805_v57 = vld [vmem:[#allocation7] sm:$0xff] }
 0x331   : > { %802 = vst.msk [vmem:[#allocation6 + $0x8] sm:$0xff] %vm588_vm2, %v798_v58 }
 0x332   : > { %v822_v50 = vpop.permute.xlu2 %821 }
 0x333   : > { %v831_v61 = vmul.f32 %v822_v50, %v807_v59  ;;  %v853_v50 = vpop.f32.mrf.mxu2 }
 0x334   : > { %v944_v63 = vld [vmem:[#allocation6 + $0x18] sm:$0xff] }
 0x335   : > { %v927_v0 = vadd.f32 %v899_v62, %v831_v61  ;;  %1389 = vrcp.f32 %v944_v63  ;;  %v996_v14 = vand.u32 2147483647, %v944_v63  ;;  %v998_v15 = vand.u32 2147483648, %v944_v63 }
 0x336   : > { %v787_v2 = vpop.xlane.xlu0 %786  ;;  %vm992_vm8 = vweird.f32 %v944_v63 }
 0x337   : > { %931 = vst.msk [vmem:[#allocation7 + $0x10] sm:$0xff] %vm495_vm1, %v927_v0  ;;  %v797_v3 = vadd.f32 %v787_v2, %v781_v1  ;;  %vm997_vm10 = vcmp.eq.f32.partialorder %v996_v14, 8.507059e+37  ;;  %v999_v21 = vor.u32 1.1754944e-38, %v998_v15  ;;  %v1047_v0 = vld [vmem:[#allocation17 + $0x10] sm:$0xff]  ;;  %v1046_v1 = vld [vmem:[#allocation17 + $0x8] sm:$0xff]  ;;  %v1045_v2 = vld [vmem:[#allocation17] sm:$0xff] }
 0x338   : > { %v942_v4 = vld [vmem:[#allocation6 + $0x8] sm:$0xff] }
 0x339   : > { %801 = vst.msk [vmem:[#allocation6] sm:$0xff] %vm588_vm2, %v797_v3  ;;  %1391 = vrcp.f32 %v942_v4  ;;  %v970_v22 = vand.u32 2147483648, %v942_v4  ;;  %v968_v25 = vand.u32 2147483647, %v942_v4  ;;  %vm964_vm12 = vweird.f32 %v942_v4  ;;  %v922_v37 = vpop.f32.mrf.mxu1 }
 0x33b   : > { %v1390_v7 = vpop.eup %1389  ;;  %v971_v30 = vor.u32 1.1754944e-38, %v970_v22  ;;  %vm969_vm14 = vcmp.eq.f32.partialorder %v968_v25, 8.507059e+37 }
 0x33c   : > { %v988_v9 = vmul.f32 %v1390_v7, %v944_v63  ;;  %vm993_vm7 = vweird.f32 %v1390_v7  ;;  %v1048_v63 = vld [vmem:[#allocation17 + $0x18] sm:$0xff] }
 0x33d   : > { %v876_v10 = vpop.f32.mrf.mxu3  ;;  %vm994_vm9 = vmor %vm992_vm8, %vm993_vm7  ;;  %1068 = vmatpush.msra.mxu2 %v1048_v63  ;;  %vm1042_vm7 = vcmask 261312  }
 0x33e   : > { %v926_v11 = vadd.f32 %v876_v10, %v830_v8  ;;  %v989_v12 = vsub.f32 1.0, %v988_v9  ;;  %v939_v47 = vld [vmem:[#allocation7 + $0x10] sm:$0xff] }
 0x33f   : > { %v1392_v13 = vpop.eup %1391  ;;  %1069 = vmatpush.msra.mxu2 %v1047_v0 }
 0x340   : > { %930 = vst.msk [vmem:[#allocation7 + $0x8] sm:$0xff] %vm495_vm1, %v926_v11  ;;  %v990_v16 = vmul.f32 %v1390_v7, %v989_v12  ;;  %v960_v17 = vmul.f32 %v1392_v13, %v942_v4  ;;  %v941_v18 = vld [vmem:[#allocation6] sm:$0xff]  ;;  %vm965_vm11 = vweird.f32 %v1392_v13 }
 0x341   : > { %1393 = vrcp.f32 %v941_v18  ;;  %vm966_vm13 = vmor %vm964_vm12, %vm965_vm11  ;;  %v956_v38 = vand.u32 2147483648, %v941_v18  ;;  %v954_v41 = vand.u32 2147483647, %v941_v18  ;;  %vm950_vm2 = vweird.f32 %v941_v18  ;;  %1070 = vmatpush.msra.mxu2 %v1046_v1 }
 0x342   : > { %v991_v19 = vadd.f32 %v1390_v7, %v990_v16  ;;  %v961_v20 = vsub.f32 1.0, %v960_v17 }
 0x343   : > { %v957_v43 = vor.u32 1.1754944e-38, %v956_v38  ;;  %vm955_vm4 = vcmp.eq.f32.partialorder %v954_v41, 8.507059e+37  ;;  %1071 = vmatpush.msra.mxu2 %v1045_v2 }
 0x344   : > { %v995_v23 = vsel %vm994_vm9, %v1390_v7, %v991_v19  ;;  %v962_v24 = vmul.f32 %v1392_v13, %v961_v20  ;;  %v1370_v7 = vld [vmem:[%s2005_s8] ss:$0 sm:$0xff] }
 0x345   : > { %v1000_v26 = vsel %vm997_vm10, %v999_v21, %v995_v23 }
 0x346   : > { %1018 = vperm.xlu2 %1365, %v1000_v26   ;;  %v963_v27 = vadd.f32 %v1392_v13, %v962_v24 }
 0x347   : > { %v1394_v28 = vpop.eup %1393  ;;  %v938_v54 = vld [vmem:[#allocation7 + $0x8] sm:$0xff] }
 0x348   : > { %v967_v31 = vsel %vm966_vm13, %v1392_v13, %v963_v27  ;;  %v946_v32 = vmul.f32 %v1394_v28, %v941_v18  ;;  %vm951_vm15 = vweird.f32 %v1394_v28 }
 0x349   : > { %v827_v33 = vpop.permute.xlu0 %826  ;;  %v972_v34 = vsel %vm969_vm14, %v971_v30, %v967_v31  ;;  %vm952_vm3 = vmor %vm950_vm2, %vm951_vm15 }
 0x34a   : > { %v832_v35 = vmul.f32 %v827_v33, %v808_v29  ;;  %1008 = vperm.xlu1 %1366, %v972_v34   ;;  %v947_v36 = vsub.f32 1.0, %v946_v32 }
 0x34c   : > { %v928_v39 = vadd.f32 %v922_v37, %v832_v35  ;;  %v948_v40 = vmul.f32 %v1394_v28, %v947_v36 }
 0x34e   : > { %932 = vst.msk [vmem:[#allocation7 + $0x18] sm:$0xff] %vm495_vm1, %v928_v39  ;;  %v949_v42 = vadd.f32 %v1394_v28, %v948_v40 }
 0x350   : > { %v953_v44 = vsel %vm952_vm3, %v1394_v28, %v949_v42 }
 0x351   : > { %v958_v45 = vsel %vm955_vm4, %v957_v43, %v953_v44 }
 0x352   : > { %1003 = vperm.xlu0 %1364, %v958_v45   ;;  %811 = vperm.xlu1 %1366, %v1942_v46  }
 0x355   : > { %v940_v52 = vld [vmem:[#allocation7 + $0x18] sm:$0xff] }
 0x398   : > { %v1014_v48 = vpop.permute.xlu0 %1013 }
 0x399   : > { %v1023_v49 = vmul.f32 %v1014_v48, %v939_v47 }
 0x39b   : > { %1033 = vrot.lane.b32.xlu1 %v1023_v49, %s1649_s17  ;;  %s1559_s17 = sshra.s32 %s1094_s25, 4  ;;  %s1560_s17 = int_to_ptr.hbm [resolvable:$true] %s1559_s17 }
 0x39c   : > { %p1566_p9 = scmp.lt.s32.totalorder %s1560_s17, %s2006_s9 }
 0x3a0   : > { %v1019_v51 = vpop.permute.xlu2 %1018 }
 0x3a1   : > { %v1024_v53 = vmul.f32 %v1019_v51, %v940_v52 }
 0x3a3   : > { %1039 = vrot.lane.b32.xlu0 %v1024_v53, %s1650_s29  ;;  %s1561_s29 = scalar_lea.hbm %s1560_s17, 8 }
 0x3a4   : > { %p1562_p1 = scmp.ne.s32.totalorder %s1560_s17, %s1561_s29  ;;  %p1567_p10 = scmp.lt.s32.totalorder %s1565_s21, %s1561_s29 }
 0x3a6   : > { %p1563_p3 = pnand %p1562_p1, %p1794_p0  ;;  %p1568_p12 = por %p1567_p10, %p1566_p9 }
 0x3a8   : > { %p1564_p8 = pneg %p1563_p3 }
 0x3aa   : > { %p1569_p13 = pnand %p1568_p12, %p1564_p8 }
 0x3bc   : > { %v1009_v55 = vpop.permute.xlu1 %1008 }
 0x3bd   : > { %v1022_v56 = vmul.f32 %v1009_v55, %v938_v54 }
 0x3bf   : > { %1027 = vrot.lane.b32.xlu2 %v1022_v56, %s1651_s18 }
 0x3c4   : > { %v812_v58 = vpop.permute.xlu1 %811  ;;  %v1004_v60 = vpop.permute.xlu0 %1003 }
 0x3c5   : > { %v829_v59 = vmul.f32 %v812_v58, %v805_v57 }
 0x3c7   : > { %v925_v46 = vadd.f32 %v853_v50, %v829_v59 }
 0x3c9   : > { %929 = vst.msk [vmem:[#allocation7] sm:$0xff] %vm495_vm1, %v925_v46 }
 0x3d0   : > { %v937_v61 = vld [vmem:[#allocation7] sm:$0xff] }
 0x3d1   : > { %v1021_v62 = vmul.f32 %v1004_v60, %v937_v61 }
 0x3d3   : > { %1025 = vst.msk [vmem:[#allocation8] sm:$0xff] %vm495_vm1, %v1021_v62 }
 0x40d   : > { %v1034_v4 = vpop.permute.xlu1 %1033 }
 0x415   : > { %v1040_v5 = vpop.permute.xlu0 %1039 }
 0x419   : > { %v1028_v3 = vpop.permute.xlu2 %1027 }
 0x41a   : > { %1031 = vst.msk [vmem:[#allocation8] sm:$0xff] %vm1030_vm5, %v1028_v3 }
 0x41b   : > { %1037 = vst.msk [vmem:[#allocation8] sm:$0xff] %vm1036_vm6, %v1034_v4 }
 0x41c   : > { %1043 = vst.msk [vmem:[#allocation8] sm:$0xff] %vm1042_vm7, %v1040_v5 }
 0x423   : > { %v1044_v6 = vld [vmem:[#allocation8] sm:$0xff] }
 0x424   : > { %1245 = vmatmul.msk.f32.vlgmr.msra.gmra.mxu2 %vm443_vm0, %v1044_v6 }
 0x4a7   : > { %v1073_v8 = vpop.f32.mrf.mxu2 }
 0x4a8   : > { %v1074_v9 = vadd.f32 %v1370_v7, %v1073_v8 }
 0x4aa   : > { %1076 = vst.msk [vmem:[%s429_s22] sm:$0xff] %vm443_vm0, %v1074_v9 }
 0x4ab   : > { %1572 = shalt.err (!%p1569_p13)
}
 0x4ac   : > { %1268 = dma.vmem_to_hbm [thread:$0]  (%p1794_p0), %s1092_s15, 128, %s1094_s25, %s1078_s12  }
 0x4ad PF: > { %s1105_s24 = sand.u32 1, %s1615_s30   ;;  %p1288_p2 = pnand %p1220_p6, %p1801_p5 }
 0x4ae   : > { %s1106_s16 = scalar_lea.sflag [#allocation11], %s1105_s24 }
 0x4af   : > { %p1289_p4 = pneg %p1288_p2 }
 0x4b1   : > { %1610 = dma.done.wait (%p1289_p4), %s1106_s16, 128  }
 0x4b2   : > { %1612 = vsyncadd (%p1289_p4), %s1106_s16, 4294967168  ;;  %s27_s14 = sadd.s32 1, %s1635_s14   ;;  %s2021_s30 = smov %s1619_s10 }
 0x4b3   : > { %p24_p7 = scmp.ge.s32.totalorder %s27_s14, 4   ;;  %s2022_s10 = smov %s1623_s11 }
 0x4b4   : > { %s2023_s11 = smov %s1799_s28  ;;  %s2024_s12 = smov %s1631_s13 }
 0x4b5   : > { %s2025_s13 = smov %s2027_s26  ;;  %26 = sbr.rel (!%p24_p7) target bundleno = 12 (0xc), region = 131 }
 0x4ba   :  { %1112 = vsyncpa [#allocation10], 1 }
 0x4bb   :  { %1114 = vsyncpa [#allocation10 + $0x1], 1 }
 0x4bc   :  { %1115 = vsyncpa [#allocation13], 1 }
 0x4bd   :  { %1116 = vsyncpa [#allocation16], 1 }
 0x4be   :  { %1117 = vsyncpa [#allocation11], 1 }
 0x4bf   :  { %1119 = vsyncpa [#allocation11 + $0x1], 1 }

</bundles_post_ra>
